<compile_context>
chip_gen: v6e
topology: v6e:2x2x1
jax: 0.10.0
libtpu: 0.0.40
codegen_flags: <defaults>
</compile_context>

<pallas_src>
import jax
import jax.numpy as jnp
from jax.experimental import pallas as pl
from jax.experimental.pallas import tpu as pltpu


def _round_up(v, m):
    return ((v + m - 1) // m) * m


def _make_kernel(C, TC, nc, use_mxu):
    """Build the kernel for static (C, TC, nc) and the dtype-chosen reduce path."""
    ragged = (C % TC) != 0
    tail = C - (nc - 1) * TC          # number of valid lanes in the last C tile

    def _partial(x_tile, w_tile):
        if use_mxu:
            # bf16 x bf16 -> f32 accumulate on the (otherwise idle) MXU.
            # w_tile: (TC, 1) column.  No (TB, TC) temporaries are materialized.
            return jnp.dot(x_tile, w_tile, preferred_element_type=jnp.float32)
        # Exact f32 multiply on the VPU + cross-lane reduce on the XLU.
        # w_tile: (1, TC) row.  (astype is a no-op for f32 inputs.)
        return jnp.sum(x_tile.astype(jnp.float32) * w_tile,
                       axis=-1, keepdims=True)

    def kernel(x_ref, w_ref, b_ref, o_ref, acc_ref):
        # x_ref: (TB, TC) input tile (VMEM)
        # w_ref: (TC, 1) or (1, TC) weight tile (VMEM)
        # b_ref: (1, 1) bias (SMEM)
        # o_ref: (TB, 1) output tile (VMEM, resident across the C axis)
        # acc_ref: (TB, 1) f32 partial-sum accumulator (VMEM scratch)
        k = pl.program_id(1)

        @pl.when(k == 0)
        def _init():
            acc_ref[...] = jnp.zeros_like(acc_ref)

        if not ragged:
            acc_ref[...] += _partial(x_ref[...], w_ref[...])
        else:
            @pl.when(k < nc - 1)
            def _interior():
                acc_ref[...] += _partial(x_ref[...], w_ref[...])

            @pl.when(k == nc - 1)
            def _last_tile():
                # Mask x itself (not just the weight): lanes past C in the
                # ragged edge block hold unspecified data (could be NaN/Inf).
                cols = jax.lax.broadcasted_iota(jnp.int32, (1, TC), 1)
                xm = jnp.where(cols < tail, x_ref[...], 0)
                acc_ref[...] += _partial(xm, w_ref[...])

        @pl.when(k == nc - 1)
        def _finalize():
            logits = acc_ref[...] + b_ref[0, 0]
            o_ref[...] = jax.nn.sigmoid(logits).astype(o_ref.dtype)

    return kernel


def attention_block_forward(x, weight, bias, *, block_b=2048, block_c=2048):
    """x: any shape (B, ...) that flattens to (B, in_channels).
    weight: (1, in_channels) torch nn.Linear layout. bias: scalar ().
    Returns sigmoid(x.view(B, -1) @ W.T + b) reshaped to (B, 1, 1, 1)."""
    B = x.shape[0]
    x2d = x.reshape(B, -1)                       # x.view(B, -1)
    C = x2d.shape[1]
    assert weight.shape == (1, C)
    out_dtype = x2d.dtype
    itemsize = x2d.dtype.itemsize

    # 16-bit floats -> MXU reduce; f32 (and everything else) -> exact f32 VPU.
    use_mxu = x2d.dtype in (jnp.bfloat16, jnp.float16)

    # ---- tile sizes --------------------------------------------------------
    row_align = max(8, 32 // itemsize)           # sublane packing: 8 / 16 / 32
    b_aligned = _round_up(B, row_align)
    TB = _round_up(min(block_b, b_aligned), row_align)
    # If the whole batch would fit in one tile but can be split, use >= 2
    # batch tiles so the "parallel" axis can feed both v7x TensorCores.
    if TB >= b_aligned and b_aligned >= 2 * row_align:
        TB = _round_up(pl.cdiv(b_aligned, 2), row_align)
    TC = _round_up(min(block_c, _round_up(C, 128)), 128)

    # Keep the double-buffered x tile inside every generation's VMEM budget
    # (v7x has only 64 MiB per TensorCore).
    max_x_tile_bytes = 20 * 1024 * 1024
    while TB * TC * itemsize > max_x_tile_bytes:
        if TC >= 256:
            TC = _round_up(TC // 2, 128)
        elif TB > row_align:
            TB = _round_up(TB // 2, row_align)
        else:
            break

    nb = pl.cdiv(B, TB)
    nc = pl.cdiv(C, TC)
    C_pad = nc * TC

    # ---- operands ----------------------------------------------------------
    # x is NOT padded (no extra HBM pass).  Only the tiny weight is zero-padded
    # to C_pad so garbage weight lanes can never meet masked x lanes as NaN*0.
    w_flat = weight.reshape(C)
    if C_pad != C:
        w_flat = jnp.pad(w_flat, (0, C_pad - C))
    if use_mxu:
        w_arr = w_flat.reshape(C_pad, 1).astype(x2d.dtype)     # (K, 1) column
        w_spec = pl.BlockSpec((TC, 1), lambda i, k: (k, 0))
        w_tile_bytes = TC * 128 * itemsize                     # lane-padded
    else:
        w_arr = w_flat.reshape(1, C_pad).astype(jnp.float32)   # (1, K) row
        w_spec = pl.BlockSpec((1, TC), lambda i, k: (0, k))
        w_tile_bytes = 8 * TC * 4                              # sublane-padded
    b2d = jnp.reshape(bias, (1, 1)).astype(jnp.float32)

    # ---- VMEM budget: double-buffered x + weight, accumulator, output ------
    x_tile_bytes = TB * TC * itemsize
    acc_bytes = TB * 128 * 4
    out_bytes = TB * 128 * itemsize
    vmem_limit = 2 * (x_tile_bytes + w_tile_bytes) + acc_bytes + 2 * out_bytes
    vmem_limit = int(min(48 * 1024 * 1024,
                         max(8 * 1024 * 1024, vmem_limit + 2 * 1024 * 1024)))

    kernel = _make_kernel(C, TC, nc, use_mxu)

    out = pl.pallas_call(
        kernel,
        out_shape=jax.ShapeDtypeStruct((B, 1), out_dtype),
        grid_spec=pltpu.PrefetchScalarGridSpec(
            num_scalar_prefetch=0,
            grid=(nb, nc),                                   # reduction (C) last
            in_specs=[
                pl.BlockSpec((TB, TC), lambda i, k: (i, k)),     # x tile
                w_spec,                                          # weight tile
                pl.BlockSpec(memory_space=pltpu.SMEM),           # bias scalar
            ],
            # Output block index is constant across k -> resident accumulator
            # target, written back once per batch tile.
            out_specs=pl.BlockSpec((TB, 1), lambda i, k: (i, 0)),
            scratch_shapes=[pltpu.VMEM((TB, 1), jnp.float32)],
        ),
        compiler_params=pltpu.CompilerParams(
            dimension_semantics=("parallel", "arbitrary"),
            vmem_limit_bytes=vmem_limit,
        ),
    )(x2d, w_arr, b2d)

    # torch.unsqueeze(x, 2); torch.unsqueeze(x, 3)
    return out.reshape(B, 1, 1, 1)


def init_params(in_channels, key, dtype=jnp.float32):
    # Mimic nn.Linear default init: U(-1/sqrt(fan_in), +1/sqrt(fan_in))
    kw, kb = jax.random.split(key)
    bound = 1.0 / jnp.sqrt(jnp.float32(in_channels))
    weight = jax.random.uniform(kw, (1, in_channels), jnp.float32, -bound, bound)
    bias = jax.random.uniform(kb, (), jnp.float32, -bound, bound)
    return weight.astype(dtype), bias.astype(jnp.float32)


def _reference(x, weight, bias):
    # Elementwise f32 reference (no XLA matmul-precision ambiguity).
    B = x.shape[0]
    x2d = x.reshape(B, -1).astype(jnp.float32)
    logits = jnp.sum(x2d * weight.astype(jnp.float32), axis=-1, keepdims=True) + bias
    return jax.nn.sigmoid(logits).reshape(B, 1, 1, 1)


if __name__ == "__main__":
    key = jax.random.PRNGKey(0)
    k1, k2, k3, k4 = jax.random.split(key, 4)

    # ---- Check 1: module-shaped input (B=2, flattens to in_channels=80) ----
    in_channels = 80
    x = jax.random.normal(k1, (2, 5, 4, 4), dtype=jnp.float32)   # 5*4*4 = 80
    weight, bias = init_params(in_channels, k2)
    y = jax.block_until_ready(attention_block_forward(x, weight, bias))
    assert y.shape == (2, 1, 1, 1)
    assert jnp.allclose(y, _reference(x, weight, bias), atol=1e-5, rtol=1e-5)

    # ---- Check 2: multi-tile grid path, ragged B and C, no host padding ----
    B2, C2 = 200, 200
    x2 = jax.random.normal(k3, (B2, C2), dtype=jnp.float32)
    w2, b2 = init_params(C2, k4)
    y2 = jax.block_until_ready(
        attention_block_forward(x2, w2, b2, block_b=64, block_c=128))
    assert y2.shape == (B2, 1, 1, 1)
    assert jnp.allclose(y2, _reference(x2, w2, b2), atol=1e-4, rtol=1e-4)

    # ---- Check 3: bf16 input path (MXU reduce, f32 accumulate) -------------
    x3 = x2.astype(jnp.bfloat16)
    w3 = w2.astype(jnp.bfloat16)
    y3 = jax.block_until_ready(
        attention_block_forward(x3, w3, b2, block_b=64, block_c=128))
    assert y3.shape == (B2, 1, 1, 1)
    assert jnp.allclose(y3.astype(jnp.float32), _reference(x3, w3, b2),
                        atol=2e-2, rtol=2e-2)

    print("KERNEL_OK")
</pallas_src>

<mosaic_0001>
module attributes {stable_mosaic.version = 11 : i64} {
  func.func @kernel(%arg0: i32, %arg1: i32, %arg2: memref<8x128xf32, #tpu.memory_space<vmem>>, %arg3: memref<1x128xf32, #tpu.memory_space<vmem>>, %arg4: memref<1x1xf32, #tpu.memory_space<smem>>, %arg5: memref<8x1xf32, #tpu.memory_space<vmem>>, %arg6: memref<8x1xf32, #tpu.memory_space<vmem>>) attributes {dimension_semantics = [#tpu.dimension_semantics<parallel>, #tpu.dimension_semantics<arbitrary>], iteration_bounds = array<i64: 1, 1>, scalar_prefetch = 0 : i64, scratch_operands = 1 : i64, tpu.core_type = #tpu.core_type<tc>, window_params = [{transform_indices = @transform_0, window_bounds = array<i64: 8, 128>}, {transform_indices = @transform_1, window_bounds = array<i64: 1, 128>}, {transform_indices = @transform_2, window_bounds = array<i64: 1, 1>}, {transform_indices = @transform_3, window_bounds = array<i64: 8, 1>}]} {
    %c0_i32 = arith.constant 0 : i32
    %0 = arith.cmpi eq, %arg1, %c0_i32 : i32
    %1 = arith.extui %0 : i1 to i32
    %c0_i32_0 = arith.constant 0 : i32
    %2 = arith.cmpi ne, %1, %c0_i32_0 : i32
    scf.if %2 {
      %cst = arith.constant 0.000000e+00 : f32
      %12 = vector.broadcast %cst : f32 to vector<8x1xf32>
      %c0 = arith.constant 0 : index
      %c0_7 = arith.constant 0 : index
      %13 = vector.load %arg6[%c0, %c0_7] : memref<8x1xf32, #tpu.memory_space<vmem>>, vector<8x1xf32>
      tpu.vector_store %arg6[%c0, %c0_7], %12 {strides = array<i32>} : memref<8x1xf32, #tpu.memory_space<vmem>>, vector<8x1xf32>,
    } else {
    }
    %c0_i32_1 = arith.constant 0 : i32
    %3 = arith.cmpi slt, %arg1, %c0_i32_1 : i32
    %4 = arith.extui %3 : i1 to i32
    %c0_i32_2 = arith.constant 0 : i32
    %5 = arith.cmpi ne, %4, %c0_i32_2 : i32
    scf.if %5 {
      %c0 = arith.constant 0 : index
      %c0_7 = arith.constant 0 : index
      %12 = vector.load %arg6[%c0, %c0_7] : memref<8x1xf32, #tpu.memory_space<vmem>>, vector<8x1xf32>
      %c0_8 = arith.constant 0 : index
      %c0_9 = arith.constant 0 : index
      %13 = vector.load %arg2[%c0_8, %c0_9] : memref<8x128xf32, #tpu.memory_space<vmem>>, vector<8x128xf32>
      %c0_10 = arith.constant 0 : index
      %c0_11 = arith.constant 0 : index
      %14 = vector.load %arg3[%c0_10, %c0_11] : memref<1x128xf32, #tpu.memory_space<vmem>>, vector<1x128xf32>
      %15 = vector.broadcast %14 : vector<1x128xf32> to vector<8x128xf32>
      %16 = arith.mulf %13, %15 : vector<8x128xf32>
      %cst = arith.constant dense<0.000000e+00> : vector<8xf32>
      %17 = vector.multi_reduction <add>, %16, %cst [1] : vector<8x128xf32> to vector<8xf32>
      %18 = vector.shape_cast %17 : vector<8xf32> to vector<8x1xf32>
      %19 = arith.addf %12, %18 : vector<8x1xf32>
      %c0_12 = arith.constant 0 : index
      %c0_13 = arith.constant 0 : index
      %20 = vector.load %arg6[%c0_12, %c0_13] : memref<8x1xf32, #tpu.memory_space<vmem>>, vector<8x1xf32>
      tpu.vector_store %arg6[%c0_12, %c0_13], %19 {strides = array<i32>} : memref<8x1xf32, #tpu.memory_space<vmem>>, vector<8x1xf32>,
    } else {
    }
    %c0_i32_3 = arith.constant 0 : i32
    %6 = arith.cmpi eq, %arg1, %c0_i32_3 : i32
    %7 = arith.extui %6 : i1 to i32
    %c0_i32_4 = arith.constant 0 : i32
    %8 = arith.cmpi ne, %7, %c0_i32_4 : i32
    scf.if %8 {
      %12 = tpu.iota {dimensions = array<i32: 1>} : vector<1x128xi32>
      %c80_i32 = arith.constant 80 : i32
      %13 = vector.broadcast %c80_i32 : i32 to vector<1x128xi32>
      %14 = arith.cmpi slt, %12, %13 : vector<1x128xi32>
      %c0 = arith.constant 0 : index
      %c0_7 = arith.constant 0 : index
      %15 = vector.load %arg2[%c0, %c0_7] : memref<8x128xf32, #tpu.memory_space<vmem>>, vector<8x128xf32>
      %c0_i32_8 = arith.constant 0 : i32
      %16 = arith.sitofp %c0_i32_8 : i32 to f32
      %17 = vector.shape_cast %14 : vector<1x128xi1> to vector<1x128xi1>
      %18 = vector.broadcast %17 : vector<1x128xi1> to vector<8x128xi1>
      %19 = vector.broadcast %16 : f32 to vector<8x128xf32>
      %20 = arith.select %18, %15, %19 : vector<8x128xi1>, vector<8x128xf32>
      %c0_9 = arith.constant 0 : index
      %c0_10 = arith.constant 0 : index
      %21 = vector.load %arg6[%c0_9, %c0_10] : memref<8x1xf32, #tpu.memory_space<vmem>>, vector<8x1xf32>
      %c0_11 = arith.constant 0 : index
      %c0_12 = arith.constant 0 : index
      %22 = vector.load %arg3[%c0_11, %c0_12] : memref<1x128xf32, #tpu.memory_space<vmem>>, vector<1x128xf32>
      %23 = vector.broadcast %22 : vector<1x128xf32> to vector<8x128xf32>
      %24 = arith.mulf %20, %23 : vector<8x128xf32>
      %cst = arith.constant dense<0.000000e+00> : vector<8xf32>
      %25 = vector.multi_reduction <add>, %24, %cst [1] : vector<8x128xf32> to vector<8xf32>
      %26 = vector.shape_cast %25 : vector<8xf32> to vector<8x1xf32>
      %27 = arith.addf %21, %26 : vector<8x1xf32>
      %c0_13 = arith.constant 0 : index
      %c0_14 = arith.constant 0 : index
      %28 = vector.load %arg6[%c0_13, %c0_14] : memref<8x1xf32, #tpu.memory_space<vmem>>, vector<8x1xf32>
      tpu.vector_store %arg6[%c0_13, %c0_14], %27 {strides = array<i32>} : memref<8x1xf32, #tpu.memory_space<vmem>>, vector<8x1xf32>,
    } else {
    }
    %c0_i32_5 = arith.constant 0 : i32
    %9 = arith.cmpi eq, %arg1, %c0_i32_5 : i32
    %10 = arith.extui %9 : i1 to i32
    %c0_i32_6 = arith.constant 0 : i32
    %11 = arith.cmpi ne, %10, %c0_i32_6 : i32
    scf.if %11 {
      %c0 = arith.constant 0 : index
      %c0_7 = arith.constant 0 : index
      %12 = vector.load %arg6[%c0, %c0_7] : memref<8x1xf32, #tpu.memory_space<vmem>>, vector<8x1xf32>
      %c0_8 = arith.constant 0 : index
      %c0_9 = arith.constant 0 : index
      %13 = memref.load %arg4[%c0_8, %c0_9] : memref<1x1xf32, #tpu.memory_space<smem>>
      %14 = vector.broadcast %13 : f32 to vector<8x1xf32>
      %15 = arith.addf %12, %14 : vector<8x1xf32>
      %16 = arith.negf %15 : vector<8x1xf32>
      %17 = math.exp %16 : vector<8x1xf32>
      %cst = arith.constant 1.000000e+00 : f32
      %18 = vector.broadcast %cst : f32 to vector<8x1xf32>
      %19 = arith.addf %18, %17 : vector<8x1xf32>
      %20 = arith.divf %18, %19 : vector<8x1xf32>
      %c0_10 = arith.constant 0 : index
      %c0_11 = arith.constant 0 : index
      %21 = vector.load %arg5[%c0_10, %c0_11] : memref<8x1xf32, #tpu.memory_space<vmem>>, vector<8x1xf32>
      tpu.vector_store %arg5[%c0_10, %c0_11], %20 {strides = array<i32>} : memref<8x1xf32, #tpu.memory_space<vmem>>, vector<8x1xf32>,
    } else {
    }
    return
  }
  func.func @transform_0(%arg0: i32, %arg1: i32) -> (i32, i32) {
    %c0_i32 = arith.constant 0 : i32
    return %arg0, %arg1 : i32, i32
  }
  func.func @transform_1(%arg0: i32, %arg1: i32) -> (i32, i32) {
    %c0_i32 = arith.constant 0 : i32
    %c0_i32_0 = arith.constant 0 : i32
    return %c0_i32, %arg1 : i32, i32
  }
  func.func @transform_2(%arg0: i32, %arg1: i32) -> (i32, i32) {
    %c0_i32 = arith.constant 0 : i32
    %c0_i32_0 = arith.constant 0 : i32
    %c0_i32_1 = arith.constant 0 : i32
    return %c0_i32, %c0_i32_0 : i32, i32
  }
  func.func @transform_3(%arg0: i32, %arg1: i32) -> (i32, i32) {
    %c0_i32 = arith.constant 0 : i32
    %c0_i32_0 = arith.constant 0 : i32
    return %arg0, %c0_i32 : i32, i32
  }
}

</mosaic_0001>

<bundles_post_ra>
// kernel: tpu_custom_call.1
= control target key start
LH: loop header
LB: loop body
LE: loop exit
PB: predicated region body
PF: predicated region fallthrough
CT: control target
= control target key end

     0   :  { %v43_v0 = vlaneseq  ;;  %vm19_vm0 = vcmask 7168   ;;  %v124_v1 = vmov 0.0   ;;  %s160_s0 = inlined_call_operand.vmem [shape: f32[2,80], index: 0, kind: input, shape index: {}]   ;;  %s161_s1 = inlined_call_operand.vmem [shape: f32[1,128], index: 1, kind: input, shape index: {}]   ;;  %s162_s2 = inlined_call_operand.<no memory space> [shape: f32[1,1], index: 2, kind: input, shape index: {}]   ;;  %s163_s3 = inlined_call_operand.vmem [shape: f32[2,1], index: 3, kind: output, shape index: {}]  }
   0x1   :  { %20 = vst.msk [vmem:[#allocation2] sm:$0xff] %vm19_vm0, %v124_v1  ;;  %v46_v3 = vld [vmem:[%s160_s0] sm:$0xff]  ;;  %v66_v10 = vstv %s162_s2 }
   0x2   :  { %v44_v2 = vand.u32 127, %v43_v0  ;;  %v117_v4 = vld [vmem:[%s161_s1] ss:$0 sm:$0xff] }
   0x4   :  { %vm45_vm1 = vcmp.lt.s32.totalorder %v44_v2, 80 }
   0x5   :  { %v49_v5 = vsel %vm45_vm1, %v46_v3, 0.0 }
   0x6   :  { %v58_v6 = vmul.f32 %v117_v4, %v49_v5 }
   0x8   :  { %59 = vadd.xlane.f32.xlu0 %v58_v6  ;;  %v50_v7 = vld [vmem:[#allocation2] sm:$0xff] }
  0x91   :  { %v60_v8 = vpop.xlane.xlu0 %59 }
  0x92   :  { %v61_v9 = vadd.f32 %v60_v8, %v50_v7 }
  0x94   :  { %63 = vst.msk [vmem:[#allocation2] sm:$0xff] %vm19_vm0, %v61_v9 }
  0x9b   :  { %v64_v11 = vld [vmem:[#allocation2] sm:$0xff] }
  0x9c   :  { %v67_v12 = vadd.f32 %v66_v10, %v64_v11 }
  0x9e   :  { %v118_v13 = vmul.f32 -1.442695, %v67_v12 }
  0xa0   :  { %120 = vpow2.f32 %v118_v13 }
  0xad   :  { %v121_v14 = vpop.eup %120 }
  0xae   :  { %v71_v15 = vadd.f32 1.0, %v121_v14 }
  0xb0   :  { %122 = vrcp.f32 %v71_v15 }
  0xbd   :  { %v123_v16 = vpop.eup %122 }
  0xbe   :  { %74 = vst.msk [vmem:[#allocation4] sm:$0xff] %vm19_vm0, %v123_v16 }
  0xc5   :  { %v93_v17 = vld [vmem:[#allocation4] sm:$0x3] }
  0xc6   :  { %94 = vst [vmem:[%s163_s3] sm:$0x3] %v93_v17 }

</bundles_post_ra>
